<compile_context>
chip_gen: v6e
topology: v6e:2x2x1
jax: 0.10.0
libtpu: 0.0.40
codegen_flags: <defaults>
</compile_context>

<pallas_src>
import math

import jax
import jax.numpy as jnp
from jax import lax
from jax.experimental import pallas as pl
from jax.experimental.pallas import tpu as pltpu

BN_EPS = 1e-5


# ---------------------------------------------------------------------------
# helpers
# ---------------------------------------------------------------------------
def _bn_train(h, gb, rows):
    """Training-mode BatchNorm2d (biased per-channel batch stats over `rows`)
    folded into a single scale/shift.  gb = [gamma; beta], shape [2, C]."""
    inv_n = 1.0 / rows
    m = jnp.sum(h, axis=0, keepdims=True) * inv_n
    var = jnp.sum(h * h, axis=0, keepdims=True) * inv_n - m * m
    scale = gb[0:1, :] * lax.rsqrt(var + BN_EPS)
    shift = gb[1:2, :] - m * scale
    return h * scale + shift


# ---------------------------------------------------------------------------
# fused kernel
# ---------------------------------------------------------------------------
def _st_embedding_kernel(
        dow_ref, tod_ref,                                    # scalar prefetch (SMEM)
        se_ref, w1s_ref, gb1s_ref, w2s_ref, gb2s_ref,        # SE FC params
        w1t_ref, gb1t_ref, w2t_ref, gb2t_ref,                # TE FC params
        out_ref,                                             # [TR, Nv*D] lane-dense
        se_flat_scr, te_scr):                                # VMEM scratch
    i = pl.program_id(0)
    nv, d = se_ref.shape
    rows = te_scr.shape[0]
    row_tile = out_ref.shape[0]

    @pl.when(i == 0)
    def _compute_embeddings():
        # ---- SE path: (1x1conv -> BN -> relu) -> (1x1conv -> BN) ----------
        h = jnp.dot(se_ref[...], w1s_ref[...], preferred_element_type=jnp.float32)
        h = jnp.maximum(_bn_train(h, gb1s_ref[...], nv), 0.0)
        y = jnp.dot(h, w2s_ref[...], preferred_element_type=jnp.float32)
        se_emb = _bn_train(y, gb2s_ref[...], nv)                        # [Nv, D]
        # lane-dense row-major flatten [Nv, D] -> [1, Nv*D], kept in VMEM.
        se_flat_scr[...] = jnp.concatenate(
            [se_emb[v:v + 1, :] for v in range(nv)], axis=-1)

        # ---- TE path: layer-1 one_hot@W1 == a 2-row gather of W1_te --------
        @pl.loop(0, rows)
        def _gather(r):
            te_scr[pl.ds(r, 1), :] = (
                w1t_ref[pl.ds(dow_ref[r], 1), :]
                + w1t_ref[pl.ds(7 + tod_ref[r], 1), :])

        h = jnp.maximum(_bn_train(te_scr[...], gb1t_ref[...], rows), 0.0)
        y = jnp.dot(h, w2t_ref[...], preferred_element_type=jnp.float32)
        te_scr[...] = _bn_train(y, gb2t_ref[...], rows)                 # [R, D]

    # ---- broadcast add SE + TE, lane-dense store of this row tile ----------
    r0 = pl.multiple_of(i * row_tile, row_tile)
    te_tile = te_scr[pl.ds(r0, row_tile), :]                            # [TR, D]
    out_ref[...] = (jnp.concatenate([te_tile] * nv, axis=-1)            # [TR, Nv*D]
                    + se_flat_scr[...])


# ---------------------------------------------------------------------------
# wrapper
# ---------------------------------------------------------------------------
def st_embedding_forward(params, SE, TE, points_per_hour=12, row_tile=8):
    """SE: [num_vertex, D]; TE: [B, num_his+num_pred, 3] normalized floats
    (indexed exactly like the PyTorch forward).  Returns [B, T, Nv, D]."""
    SE = SE.astype(jnp.float32)
    TE = TE.astype(jnp.float32)
    nv, d = SE.shape
    b, t = TE.shape[0], TE.shape[1]
    rows = b * t

    # TE -> integer (dayofweek, timeofday) indices; replaces the one-hot.
    dow_idx = ((((TE[..., 2] + 0.5) * 6.0).astype(jnp.int32)) % 7).reshape(rows)
    hour = (TE[..., -2] + 0.5) * 23.0
    minute = (TE[..., -1] + 0.5) * 59.0
    minofday = hour * points_per_hour + jnp.floor(minute / points_per_hour)
    tod_idx = (minofday.astype(jnp.int32) % (points_per_hour * 24)).reshape(rows)

    # Row-tile the lane-dense output (pipelined write-back, bounded VMEM).
    # TODO(synk): for production shapes raise row_tile (e.g. 256) and add an
    # Nv-tile grid axis so blocks stay within v7x's 64 MiB VMEM.
    if rows % row_tile != 0 or row_tile % 8 != 0:
        row_tile = rows
    grid = (rows // row_tile,)

    pse, pte = params["fc_se"], params["fc_te"]

    def const_spec(shape):
        zeros = (0,) * len(shape)
        return pl.BlockSpec(shape, lambda i, *_: zeros)

    out_flat = pl.pallas_call(
        _st_embedding_kernel,
        out_shape=jax.ShapeDtypeStruct((rows, nv * d), jnp.float32),
        grid_spec=pltpu.PrefetchScalarGridSpec(
            num_scalar_prefetch=2,
            grid=grid,
            in_specs=[const_spec(SE.shape),
                      const_spec(pse["w1"].shape), const_spec(pse["gb1"].shape),
                      const_spec(pse["w2"].shape), const_spec(pse["gb2"].shape),
                      const_spec(pte["w1"].shape), const_spec(pte["gb1"].shape),
                      const_spec(pte["w2"].shape), const_spec(pte["gb2"].shape)],
            out_specs=pl.BlockSpec((row_tile, nv * d), lambda i, *_: (i, 0)),
            scratch_shapes=[pltpu.VMEM((1, nv * d), jnp.float32),   # se_flat
                            pltpu.VMEM((rows, d), jnp.float32)],    # te_emb
        ),
        # Step-0 compute feeds later steps via VMEM scratch -> "arbitrary".
        compiler_params=pltpu.CompilerParams(dimension_semantics=("arbitrary",)),
    )(dow_idx, tod_idx, SE,
      pse["w1"], pse["gb1"], pse["w2"], pse["gb2"],
      pte["w1"], pte["gb1"], pte["w2"], pte["gb2"])

    # Free reshape: [B*T, Nv*D] row-major == [B, T, Nv, D] row-major.
    return out_flat.reshape(b, t, nv, d)


# ---------------------------------------------------------------------------
# parameters (Conv2d 1x1 xavier_uniform; bias dropped -- no-op under BN;
# BatchNorm gamma=1 / beta=0, packed as one [2, C] array per layer)
# ---------------------------------------------------------------------------
def _xavier_uniform(key, fan_in, fan_out):
    bound = math.sqrt(6.0 / (fan_in + fan_out))
    return jax.random.uniform(key, (fan_in, fan_out), jnp.float32, -bound, bound)


def init_st_embedding_params(key, D):
    ks = jax.random.split(key, 4)

    def layer(k, cin, cout):
        return (_xavier_uniform(k, cin, cout),
                jnp.stack([jnp.ones((cout,), jnp.float32),     # gamma
                           jnp.zeros((cout,), jnp.float32)]))  # beta

    w1s, gb1s = layer(ks[0], D, D)
    w2s, gb2s = layer(ks[1], D, D)
    w1t, gb1t = layer(ks[2], 295, D)
    w2t, gb2t = layer(ks[3], D, D)
    return dict(fc_se=dict(w1=w1s, gb1=gb1s, w2=w2s, gb2=gb2s),
                fc_te=dict(w1=w1t, gb1=gb1t, w2=w2t, gb2=gb2t))


# ---------------------------------------------------------------------------
# pure-JAX reference (replicates the PyTorch forward: one-hot matmul, 2-pass BN)
# ---------------------------------------------------------------------------
def _reference_forward(params, SE, TE, points_per_hour=12):
    def fc(x, p):
        def layer(x, w, gb, act):
            h = x @ w
            m = jnp.mean(h, axis=0, keepdims=True)
            v = jnp.mean((h - m) ** 2, axis=0, keepdims=True)
            h = (h - m) / jnp.sqrt(v + BN_EPS) * gb[0] + gb[1]
            return jnp.maximum(h, 0.0) if act else h
        return layer(layer(x, p["w1"], p["gb1"], True), p["w2"], p["gb2"], False)

    SE = SE.astype(jnp.float32)
    TE = TE.astype(jnp.float32)
    nv, d = SE.shape
    b, t = TE.shape[0], TE.shape[1]
    se_emb = fc(SE, params["fc_se"])                                    # [Nv, D]
    dow = jax.nn.one_hot(((TE[..., 2] + 0.5) * 6.0).astype(jnp.int32) % 7,
                         7, dtype=jnp.float32)
    hour = (TE[..., -2] + 0.5) * 23.0
    minute = (TE[..., -1] + 0.5) * 59.0
    minofday = hour * points_per_hour + jnp.floor(minute / points_per_hour)
    tod = jax.nn.one_hot(minofday.astype(jnp.int32) % (points_per_hour * 24),
                         points_per_hour * 24, dtype=jnp.float32)
    te_1h = jnp.concatenate([dow, tod], axis=-1).reshape(b * t, 295)
    te_emb = fc(te_1h, params["fc_te"]).reshape(b, t, 1, d)
    return se_emb[None, None, :, :] + te_emb


if __name__ == "__main__":
    D, NV, B, T = 32, 16, 2, 8
    key = jax.random.PRNGKey(0)
    k_se, k_te, k_p = jax.random.split(key, 3)
    SE = jax.random.normal(k_se, (NV, D), jnp.float32)                  # [num_vertex, D]
    TE = jax.random.uniform(k_te, (B, T, 3), jnp.float32, -0.5, 0.5)    # normalized (dow, hour, min)
    params = init_st_embedding_params(k_p, D)

    out = st_embedding_forward(params, SE, TE, points_per_hour=12)
    out = jax.block_until_ready(out)
    assert out.shape == (B, T, NV, D) and out.dtype == jnp.float32

    ref = jax.block_until_ready(_reference_forward(params, SE, TE, 12))
    max_err = float(jnp.max(jnp.abs(out - ref)))
    assert max_err < 1e-3, f"mismatch vs reference: {max_err}"
    print("KERNEL_OK")
</pallas_src>

<mosaic_0001>
module attributes {stable_mosaic.version = 11 : i64} {
  func.func @_st_embedding_kernel(%arg0: i32, %arg1: memref<16xi32, #tpu.memory_space<smem>>, %arg2: memref<16xi32, #tpu.memory_space<smem>>, %arg3: memref<16x32xf32, #tpu.memory_space<vmem>>, %arg4: memref<32x32xf32, #tpu.memory_space<vmem>>, %arg5: memref<2x32xf32, #tpu.memory_space<vmem>>, %arg6: memref<32x32xf32, #tpu.memory_space<vmem>>, %arg7: memref<2x32xf32, #tpu.memory_space<vmem>>, %arg8: memref<295x32xf32, #tpu.memory_space<vmem>>, %arg9: memref<2x32xf32, #tpu.memory_space<vmem>>, %arg10: memref<32x32xf32, #tpu.memory_space<vmem>>, %arg11: memref<2x32xf32, #tpu.memory_space<vmem>>, %arg12: memref<8x512xf32, #tpu.memory_space<vmem>>, %arg13: memref<1x512xf32, #tpu.memory_space<vmem>>, %arg14: memref<16x32xf32, #tpu.memory_space<vmem>>) attributes {dimension_semantics = [#tpu.dimension_semantics<arbitrary>], iteration_bounds = array<i64: 2>, scalar_prefetch = 2 : i64, scratch_operands = 2 : i64, tpu.core_type = #tpu.core_type<tc>, window_params = [{pipeline_mode = #tpu.pipeline_mode<synchronous>, transform_indices = @transform_0, window_bounds = array<i64: 16, 32>}, {pipeline_mode = #tpu.pipeline_mode<synchronous>, transform_indices = @transform_1, window_bounds = array<i64: 32, 32>}, {pipeline_mode = #tpu.pipeline_mode<synchronous>, transform_indices = @transform_2, window_bounds = array<i64: 2, 32>}, {pipeline_mode = #tpu.pipeline_mode<synchronous>, transform_indices = @transform_3, window_bounds = array<i64: 32, 32>}, {pipeline_mode = #tpu.pipeline_mode<synchronous>, transform_indices = @transform_4, window_bounds = array<i64: 2, 32>}, {pipeline_mode = #tpu.pipeline_mode<synchronous>, transform_indices = @transform_5, window_bounds = array<i64: 295, 32>}, {pipeline_mode = #tpu.pipeline_mode<synchronous>, transform_indices = @transform_6, window_bounds = array<i64: 2, 32>}, {pipeline_mode = #tpu.pipeline_mode<synchronous>, transform_indices = @transform_7, window_bounds = array<i64: 32, 32>}, {pipeline_mode = #tpu.pipeline_mode<synchronous>, transform_indices = @transform_8, window_bounds = array<i64: 2, 32>}, {transform_indices = @transform_9, window_bounds = array<i64: 8, 512>}]} {
    %c0_i32 = arith.constant 0 : i32
    %0 = arith.cmpi eq, %arg0, %c0_i32 : i32
    %1 = arith.extui %0 : i1 to i32
    %c0_i32_0 = arith.constant 0 : i32
    %2 = arith.cmpi ne, %1, %c0_i32_0 : i32
    scf.if %2 {
      %c0_5 = arith.constant 0 : index
      %c0_6 = arith.constant 0 : index
      %12 = vector.load %arg3[%c0_5, %c0_6] : memref<16x32xf32, #tpu.memory_space<vmem>>, vector<16x32xf32>
      %c0_7 = arith.constant 0 : index
      %c0_8 = arith.constant 0 : index
      %13 = vector.load %arg4[%c0_7, %c0_8] : memref<32x32xf32, #tpu.memory_space<vmem>>, vector<32x32xf32>
      %cst = arith.constant dense<0.000000e+00> : vector<16x32xf32>
      %14 = tpu.matmul %12, %13, %cst {dimension_numbers = #tpu.dot_dimension_numbers<[1], [0], [0], [1], [0, 0, 1, 1], [], []>} : vector<16x32xf32>, vector<32x32xf32>, vector<16x32xf32> -> vector<16x32xf32>
      %c0_9 = arith.constant 0 : index
      %c0_10 = arith.constant 0 : index
      %15 = vector.load %arg5[%c0_9, %c0_10] : memref<2x32xf32, #tpu.memory_space<vmem>>, vector<2x32xf32>
      %cst_11 = arith.constant dense<0.000000e+00> : vector<32xf32>
      %16 = vector.multi_reduction <add>, %14, %cst_11 [0] : vector<16x32xf32> to vector<32xf32>
      %17 = vector.shape_cast %16 : vector<32xf32> to vector<1x32xf32>
      %cst_12 = arith.constant 6.250000e-02 : f32
      %18 = vector.broadcast %cst_12 : f32 to vector<1x32xf32>
      %19 = arith.mulf %17, %18 : vector<1x32xf32>
      %20 = arith.mulf %14, %14 : vector<16x32xf32>
      %cst_13 = arith.constant dense<0.000000e+00> : vector<32xf32>
      %21 = vector.multi_reduction <add>, %20, %cst_13 [0] : vector<16x32xf32> to vector<32xf32>
      %22 = vector.shape_cast %21 : vector<32xf32> to vector<1x32xf32>
      %cst_14 = arith.constant 6.250000e-02 : f32
      %23 = vector.broadcast %cst_14 : f32 to vector<1x32xf32>
      %24 = arith.mulf %22, %23 : vector<1x32xf32>
      %25 = arith.mulf %19, %19 : vector<1x32xf32>
      %26 = arith.subf %24, %25 : vector<1x32xf32>
      %27 = vector.extract_strided_slice %15 {offsets = [0, 0], sizes = [1, 32], strides = [1, 1]} : vector<2x32xf32> to vector<1x32xf32>
      %cst_15 = arith.constant 9.99999974E-6 : f32
      %28 = vector.broadcast %cst_15 : f32 to vector<1x32xf32>
      %29 = arith.addf %26, %28 : vector<1x32xf32>
      %30 = math.rsqrt %29 : vector<1x32xf32>
      %31 = arith.mulf %27, %30 : vector<1x32xf32>
      %32 = vector.extract_strided_slice %15 {offsets = [1, 0], sizes = [1, 32], strides = [1, 1]} : vector<2x32xf32> to vector<1x32xf32>
      %33 = arith.mulf %19, %31 : vector<1x32xf32>
      %34 = arith.subf %32, %33 : vector<1x32xf32>
      %35 = vector.broadcast %31 : vector<1x32xf32> to vector<16x32xf32>
      %36 = arith.mulf %14, %35 : vector<16x32xf32>
      %37 = vector.broadcast %34 : vector<1x32xf32> to vector<16x32xf32>
      %38 = arith.addf %36, %37 : vector<16x32xf32>
      %cst_16 = arith.constant 0.000000e+00 : f32
      %39 = vector.broadcast %cst_16 : f32 to vector<16x32xf32>
      %40 = arith.maximumf %38, %39 : vector<16x32xf32>
      %c0_17 = arith.constant 0 : index
      %c0_18 = arith.constant 0 : index
      %41 = vector.load %arg6[%c0_17, %c0_18] : memref<32x32xf32, #tpu.memory_space<vmem>>, vector<32x32xf32>
      %cst_19 = arith.constant dense<0.000000e+00> : vector<16x32xf32>
      %42 = tpu.matmul %40, %41, %cst_19 {dimension_numbers = #tpu.dot_dimension_numbers<[1], [0], [0], [1], [0, 0, 1, 1], [], []>} : vector<16x32xf32>, vector<32x32xf32>, vector<16x32xf32> -> vector<16x32xf32>
      %c0_20 = arith.constant 0 : index
      %c0_21 = arith.constant 0 : index
      %43 = vector.load %arg7[%c0_20, %c0_21] : memref<2x32xf32, #tpu.memory_space<vmem>>, vector<2x32xf32>
      %cst_22 = arith.constant dense<0.000000e+00> : vector<32xf32>
      %44 = vector.multi_reduction <add>, %42, %cst_22 [0] : vector<16x32xf32> to vector<32xf32>
      %45 = vector.shape_cast %44 : vector<32xf32> to vector<1x32xf32>
      %cst_23 = arith.constant 6.250000e-02 : f32
      %46 = vector.broadcast %cst_23 : f32 to vector<1x32xf32>
      %47 = arith.mulf %45, %46 : vector<1x32xf32>
      %48 = arith.mulf %42, %42 : vector<16x32xf32>
      %cst_24 = arith.constant dense<0.000000e+00> : vector<32xf32>
      %49 = vector.multi_reduction <add>, %48, %cst_24 [0] : vector<16x32xf32> to vector<32xf32>
      %50 = vector.shape_cast %49 : vector<32xf32> to vector<1x32xf32>
      %cst_25 = arith.constant 6.250000e-02 : f32
      %51 = vector.broadcast %cst_25 : f32 to vector<1x32xf32>
      %52 = arith.mulf %50, %51 : vector<1x32xf32>
      %53 = arith.mulf %47, %47 : vector<1x32xf32>
      %54 = arith.subf %52, %53 : vector<1x32xf32>
      %55 = vector.extract_strided_slice %43 {offsets = [0, 0], sizes = [1, 32], strides = [1, 1]} : vector<2x32xf32> to vector<1x32xf32>
      %cst_26 = arith.constant 9.99999974E-6 : f32
      %56 = vector.broadcast %cst_26 : f32 to vector<1x32xf32>
      %57 = arith.addf %54, %56 : vector<1x32xf32>
      %58 = math.rsqrt %57 : vector<1x32xf32>
      %59 = arith.mulf %55, %58 : vector<1x32xf32>
      %60 = vector.extract_strided_slice %43 {offsets = [1, 0], sizes = [1, 32], strides = [1, 1]} : vector<2x32xf32> to vector<1x32xf32>
      %61 = arith.mulf %47, %59 : vector<1x32xf32>
      %62 = arith.subf %60, %61 : vector<1x32xf32>
      %63 = vector.broadcast %59 : vector<1x32xf32> to vector<16x32xf32>
      %64 = arith.mulf %42, %63 : vector<16x32xf32>
      %65 = vector.broadcast %62 : vector<1x32xf32> to vector<16x32xf32>
      %66 = arith.addf %64, %65 : vector<16x32xf32>
      %67 = vector.extract_strided_slice %66 {offsets = [0, 0], sizes = [1, 32], strides = [1, 1]} : vector<16x32xf32> to vector<1x32xf32>
      %68 = vector.extract_strided_slice %66 {offsets = [1, 0], sizes = [1, 32], strides = [1, 1]} : vector<16x32xf32> to vector<1x32xf32>
      %69 = vector.extract_strided_slice %66 {offsets = [2, 0], sizes = [1, 32], strides = [1, 1]} : vector<16x32xf32> to vector<1x32xf32>
      %70 = vector.extract_strided_slice %66 {offsets = [3, 0], sizes = [1, 32], strides = [1, 1]} : vector<16x32xf32> to vector<1x32xf32>
      %71 = vector.extract_strided_slice %66 {offsets = [4, 0], sizes = [1, 32], strides = [1, 1]} : vector<16x32xf32> to vector<1x32xf32>
      %72 = vector.extract_strided_slice %66 {offsets = [5, 0], sizes = [1, 32], strides = [1, 1]} : vector<16x32xf32> to vector<1x32xf32>
      %73 = vector.extract_strided_slice %66 {offsets = [6, 0], sizes = [1, 32], strides = [1, 1]} : vector<16x32xf32> to vector<1x32xf32>
      %74 = vector.extract_strided_slice %66 {offsets = [7, 0], sizes = [1, 32], strides = [1, 1]} : vector<16x32xf32> to vector<1x32xf32>
      %75 = vector.extract_strided_slice %66 {offsets = [8, 0], sizes = [1, 32], strides = [1, 1]} : vector<16x32xf32> to vector<1x32xf32>
      %76 = vector.extract_strided_slice %66 {offsets = [9, 0], sizes = [1, 32], strides = [1, 1]} : vector<16x32xf32> to vector<1x32xf32>
      %77 = vector.extract_strided_slice %66 {offsets = [10, 0], sizes = [1, 32], strides = [1, 1]} : vector<16x32xf32> to vector<1x32xf32>
      %78 = vector.extract_strided_slice %66 {offsets = [11, 0], sizes = [1, 32], strides = [1, 1]} : vector<16x32xf32> to vector<1x32xf32>
      %79 = vector.extract_strided_slice %66 {offsets = [12, 0], sizes = [1, 32], strides = [1, 1]} : vector<16x32xf32> to vector<1x32xf32>
      %80 = vector.extract_strided_slice %66 {offsets = [13, 0], sizes = [1, 32], strides = [1, 1]} : vector<16x32xf32> to vector<1x32xf32>
      %81 = vector.extract_strided_slice %66 {offsets = [14, 0], sizes = [1, 32], strides = [1, 1]} : vector<16x32xf32> to vector<1x32xf32>
      %82 = vector.extract_strided_slice %66 {offsets = [15, 0], sizes = [1, 32], strides = [1, 1]} : vector<16x32xf32> to vector<1x32xf32>
      %83 = tpu.concatenate %67, %68, %69, %70, %71, %72, %73, %74, %75, %76, %77, %78, %79, %80, %81, %82 in 1 : vector<1x32xf32>, vector<1x32xf32>, vector<1x32xf32>, vector<1x32xf32>, vector<1x32xf32>, vector<1x32xf32>, vector<1x32xf32>, vector<1x32xf32>, vector<1x32xf32>, vector<1x32xf32>, vector<1x32xf32>, vector<1x32xf32>, vector<1x32xf32>, vector<1x32xf32>, vector<1x32xf32>, vector<1x32xf32> -> vector<1x512xf32>
      %c0_27 = arith.constant 0 : index
      %c0_28 = arith.constant 0 : index
      %84 = vector.load %arg13[%c0_27, %c0_28] : memref<1x512xf32, #tpu.memory_space<vmem>>, vector<1x512xf32>
      tpu.vector_store %arg13[%c0_27, %c0_28], %83 {strides = array<i32>} : memref<1x512xf32, #tpu.memory_space<vmem>>, vector<1x512xf32>,
      %c0_i32_29 = arith.constant 0 : i32
      %c16_i32 = arith.constant 16 : i32
      %85 = arith.addi %c0_i32_29, %c16_i32 : i32
      %c1_i32 = arith.constant 1 : i32
      scf.for %arg15 = %c0_i32_29 to %85 step %c1_i32  : i32 {
        %c1_i32_53 = arith.constant 1 : i32
        %140 = arith.muli %arg15, %c1_i32_53 : i32
        %c0_i32_54 = arith.constant 0 : i32
        %141 = arith.addi %c0_i32_54, %140 : i32
        %142 = arith.index_cast %141 : i32 to index
        %143 = memref.load %arg1[%142] : memref<16xi32, #tpu.memory_space<smem>>
        %144 = arith.index_cast %143 : i32 to index
        %c0_55 = arith.constant 0 : index
        %145 = vector.load %arg8[%144, %c0_55] : memref<295x32xf32, #tpu.memory_space<vmem>>, vector<1x32xf32>
        %146 = arith.index_cast %141 : i32 to index
        %147 = memref.load %arg2[%146] : memref<16xi32, #tpu.memory_space<smem>>
        %c7_i32 = arith.constant 7 : i32
        %148 = arith.addi %c7_i32, %147 : i32
        %149 = arith.index_cast %148 : i32 to index
        %c0_56 = arith.constant 0 : index
        %150 = vector.load %arg8[%149, %c0_56] : memref<295x32xf32, #tpu.memory_space<vmem>>, vector<1x32xf32>
        %151 = arith.addf %145, %150 : vector<1x32xf32>
        %152 = arith.index_cast %141 : i32 to index
        %c0_57 = arith.constant 0 : index
        %153 = vector.load %arg14[%152, %c0_57] : memref<16x32xf32, #tpu.memory_space<vmem>>, vector<1x32xf32>
        tpu.vector_store %arg14[%152, %c0_57], %151 {strides = array<i32>} : memref<16x32xf32, #tpu.memory_space<vmem>>, vector<1x32xf32>,
      }
      %c16_i32_30 = arith.constant 16 : i32
      %c0_31 = arith.constant 0 : index
      %c0_32 = arith.constant 0 : index
      %86 = vector.load %arg14[%c0_31, %c0_32] : memref<16x32xf32, #tpu.memory_space<vmem>>, vector<16x32xf32>
      %c0_33 = arith.constant 0 : index
      %c0_34 = arith.constant 0 : index
      %87 = vector.load %arg9[%c0_33, %c0_34] : memref<2x32xf32, #tpu.memory_space<vmem>>, vector<2x32xf32>
      %cst_35 = arith.constant dense<0.000000e+00> : vector<32xf32>
      %88 = vector.multi_reduction <add>, %86, %cst_35 [0] : vector<16x32xf32> to vector<32xf32>
      %89 = vector.shape_cast %88 : vector<32xf32> to vector<1x32xf32>
      %cst_36 = arith.constant 6.250000e-02 : f32
      %90 = vector.broadcast %cst_36 : f32 to vector<1x32xf32>
      %91 = arith.mulf %89, %90 : vector<1x32xf32>
      %92 = arith.mulf %86, %86 : vector<16x32xf32>
      %cst_37 = arith.constant dense<0.000000e+00> : vector<32xf32>
      %93 = vector.multi_reduction <add>, %92, %cst_37 [0] : vector<16x32xf32> to vector<32xf32>
      %94 = vector.shape_cast %93 : vector<32xf32> to vector<1x32xf32>
      %cst_38 = arith.constant 6.250000e-02 : f32
      %95 = vector.broadcast %cst_38 : f32 to vector<1x32xf32>
      %96 = arith.mulf %94, %95 : vector<1x32xf32>
      %97 = arith.mulf %91, %91 : vector<1x32xf32>
      %98 = arith.subf %96, %97 : vector<1x32xf32>
      %99 = vector.extract_strided_slice %87 {offsets = [0, 0], sizes = [1, 32], strides = [1, 1]} : vector<2x32xf32> to vector<1x32xf32>
      %cst_39 = arith.constant 9.99999974E-6 : f32
      %100 = vector.broadcast %cst_39 : f32 to vector<1x32xf32>
      %101 = arith.addf %98, %100 : vector<1x32xf32>
      %102 = math.rsqrt %101 : vector<1x32xf32>
      %103 = arith.mulf %99, %102 : vector<1x32xf32>
      %104 = vector.extract_strided_slice %87 {offsets = [1, 0], sizes = [1, 32], strides = [1, 1]} : vector<2x32xf32> to vector<1x32xf32>
      %105 = arith.mulf %91, %103 : vector<1x32xf32>
      %106 = arith.subf %104, %105 : vector<1x32xf32>
      %107 = vector.broadcast %103 : vector<1x32xf32> to vector<16x32xf32>
      %108 = arith.mulf %86, %107 : vector<16x32xf32>
      %109 = vector.broadcast %106 : vector<1x32xf32> to vector<16x32xf32>
      %110 = arith.addf %108, %109 : vector<16x32xf32>
      %cst_40 = arith.constant 0.000000e+00 : f32
      %111 = vector.broadcast %cst_40 : f32 to vector<16x32xf32>
      %112 = arith.maximumf %110, %111 : vector<16x32xf32>
      %c0_41 = arith.constant 0 : index
      %c0_42 = arith.constant 0 : index
      %113 = vector.load %arg10[%c0_41, %c0_42] : memref<32x32xf32, #tpu.memory_space<vmem>>, vector<32x32xf32>
      %cst_43 = arith.constant dense<0.000000e+00> : vector<16x32xf32>
      %114 = tpu.matmul %112, %113, %cst_43 {dimension_numbers = #tpu.dot_dimension_numbers<[1], [0], [0], [1], [0, 0, 1, 1], [], []>} : vector<16x32xf32>, vector<32x32xf32>, vector<16x32xf32> -> vector<16x32xf32>
      %c0_44 = arith.constant 0 : index
      %c0_45 = arith.constant 0 : index
      %115 = vector.load %arg11[%c0_44, %c0_45] : memref<2x32xf32, #tpu.memory_space<vmem>>, vector<2x32xf32>
      %cst_46 = arith.constant dense<0.000000e+00> : vector<32xf32>
      %116 = vector.multi_reduction <add>, %114, %cst_46 [0] : vector<16x32xf32> to vector<32xf32>
      %117 = vector.shape_cast %116 : vector<32xf32> to vector<1x32xf32>
      %cst_47 = arith.constant 6.250000e-02 : f32
      %118 = vector.broadcast %cst_47 : f32 to vector<1x32xf32>
      %119 = arith.mulf %117, %118 : vector<1x32xf32>
      %120 = arith.mulf %114, %114 : vector<16x32xf32>
      %cst_48 = arith.constant dense<0.000000e+00> : vector<32xf32>
      %121 = vector.multi_reduction <add>, %120, %cst_48 [0] : vector<16x32xf32> to vector<32xf32>
      %122 = vector.shape_cast %121 : vector<32xf32> to vector<1x32xf32>
      %cst_49 = arith.constant 6.250000e-02 : f32
      %123 = vector.broadcast %cst_49 : f32 to vector<1x32xf32>
      %124 = arith.mulf %122, %123 : vector<1x32xf32>
      %125 = arith.mulf %119, %119 : vector<1x32xf32>
      %126 = arith.subf %124, %125 : vector<1x32xf32>
      %127 = vector.extract_strided_slice %115 {offsets = [0, 0], sizes = [1, 32], strides = [1, 1]} : vector<2x32xf32> to vector<1x32xf32>
      %cst_50 = arith.constant 9.99999974E-6 : f32
      %128 = vector.broadcast %cst_50 : f32 to vector<1x32xf32>
      %129 = arith.addf %126, %128 : vector<1x32xf32>
      %130 = math.rsqrt %129 : vector<1x32xf32>
      %131 = arith.mulf %127, %130 : vector<1x32xf32>
      %132 = vector.extract_strided_slice %115 {offsets = [1, 0], sizes = [1, 32], strides = [1, 1]} : vector<2x32xf32> to vector<1x32xf32>
      %133 = arith.mulf %119, %131 : vector<1x32xf32>
      %134 = arith.subf %132, %133 : vector<1x32xf32>
      %135 = vector.broadcast %131 : vector<1x32xf32> to vector<16x32xf32>
      %136 = arith.mulf %114, %135 : vector<16x32xf32>
      %137 = vector.broadcast %134 : vector<1x32xf32> to vector<16x32xf32>
      %138 = arith.addf %136, %137 : vector<16x32xf32>
      %c0_51 = arith.constant 0 : index
      %c0_52 = arith.constant 0 : index
      %139 = vector.load %arg14[%c0_51, %c0_52] : memref<16x32xf32, #tpu.memory_space<vmem>>, vector<16x32xf32>
      tpu.vector_store %arg14[%c0_51, %c0_52], %138 {strides = array<i32>} : memref<16x32xf32, #tpu.memory_space<vmem>>, vector<16x32xf32>,
    } else {
    }
    %c8_i32 = arith.constant 8 : i32
    %3 = arith.muli %arg0, %c8_i32 : i32
    %4 = tpu.assume_multiple %3, 8 : i32
    %5 = arith.index_cast %4 : i32 to index
    %c0 = arith.constant 0 : index
    %6 = vector.load %arg14[%5, %c0] : memref<16x32xf32, #tpu.memory_space<vmem>>, vector<8x32xf32>
    %7 = tpu.concatenate %6, %6, %6, %6, %6, %6, %6, %6, %6, %6, %6, %6, %6, %6, %6, %6 in 1 : vector<8x32xf32>, vector<8x32xf32>, vector<8x32xf32>, vector<8x32xf32>, vector<8x32xf32>, vector<8x32xf32>, vector<8x32xf32>, vector<8x32xf32>, vector<8x32xf32>, vector<8x32xf32>, vector<8x32xf32>, vector<8x32xf32>, vector<8x32xf32>, vector<8x32xf32>, vector<8x32xf32>, vector<8x32xf32> -> vector<8x512xf32>
    %c0_1 = arith.constant 0 : index
    %c0_2 = arith.constant 0 : index
    %8 = vector.load %arg13[%c0_1, %c0_2] : memref<1x512xf32, #tpu.memory_space<vmem>>, vector<1x512xf32>
    %9 = vector.broadcast %8 : vector<1x512xf32> to vector<8x512xf32>
    %10 = arith.addf %7, %9 : vector<8x512xf32>
    %c0_3 = arith.constant 0 : index
    %c0_4 = arith.constant 0 : index
    %11 = vector.load %arg12[%c0_3, %c0_4] : memref<8x512xf32, #tpu.memory_space<vmem>>, vector<8x512xf32>
    tpu.vector_store %arg12[%c0_3, %c0_4], %10 {strides = array<i32>} : memref<8x512xf32, #tpu.memory_space<vmem>>, vector<8x512xf32>,
    return
  }
  func.func @transform_0(%arg0: i32, %arg1: memref<16xi32, #tpu.memory_space<smem>>, %arg2: memref<16xi32, #tpu.memory_space<smem>>) -> (i32, i32) {
    %c0_i32 = arith.constant 0 : i32
    %c0_i32_0 = arith.constant 0 : i32
    %c0_i32_1 = arith.constant 0 : i32
    return %c0_i32, %c0_i32_0 : i32, i32
  }
  func.func @transform_1(%arg0: i32, %arg1: memref<16xi32, #tpu.memory_space<smem>>, %arg2: memref<16xi32, #tpu.memory_space<smem>>) -> (i32, i32) {
    %c0_i32 = arith.constant 0 : i32
    %c0_i32_0 = arith.constant 0 : i32
    %c0_i32_1 = arith.constant 0 : i32
    return %c0_i32, %c0_i32_0 : i32, i32
  }
  func.func @transform_2(%arg0: i32, %arg1: memref<16xi32, #tpu.memory_space<smem>>, %arg2: memref<16xi32, #tpu.memory_space<smem>>) -> (i32, i32) {
    %c0_i32 = arith.constant 0 : i32
    %c0_i32_0 = arith.constant 0 : i32
    %c0_i32_1 = arith.constant 0 : i32
    return %c0_i32, %c0_i32_0 : i32, i32
  }
  func.func @transform_3(%arg0: i32, %arg1: memref<16xi32, #tpu.memory_space<smem>>, %arg2: memref<16xi32, #tpu.memory_space<smem>>) -> (i32, i32) {
    %c0_i32 = arith.constant 0 : i32
    %c0_i32_0 = arith.constant 0 : i32
    %c0_i32_1 = arith.constant 0 : i32
    return %c0_i32, %c0_i32_0 : i32, i32
  }
  func.func @transform_4(%arg0: i32, %arg1: memref<16xi32, #tpu.memory_space<smem>>, %arg2: memref<16xi32, #tpu.memory_space<smem>>) -> (i32, i32) {
    %c0_i32 = arith.constant 0 : i32
    %c0_i32_0 = arith.constant 0 : i32
    %c0_i32_1 = arith.constant 0 : i32
    return %c0_i32, %c0_i32_0 : i32, i32
  }
  func.func @transform_5(%arg0: i32, %arg1: memref<16xi32, #tpu.memory_space<smem>>, %arg2: memref<16xi32, #tpu.memory_space<smem>>) -> (i32, i32) {
    %c0_i32 = arith.constant 0 : i32
    %c0_i32_0 = arith.constant 0 : i32
    %c0_i32_1 = arith.constant 0 : i32
    return %c0_i32, %c0_i32_0 : i32, i32
  }
  func.func @transform_6(%arg0: i32, %arg1: memref<16xi32, #tpu.memory_space<smem>>, %arg2: memref<16xi32, #tpu.memory_space<smem>>) -> (i32, i32) {
    %c0_i32 = arith.constant 0 : i32
    %c0_i32_0 = arith.constant 0 : i32
    %c0_i32_1 = arith.constant 0 : i32
    return %c0_i32, %c0_i32_0 : i32, i32
  }
  func.func @transform_7(%arg0: i32, %arg1: memref<16xi32, #tpu.memory_space<smem>>, %arg2: memref<16xi32, #tpu.memory_space<smem>>) -> (i32, i32) {
    %c0_i32 = arith.constant 0 : i32
    %c0_i32_0 = arith.constant 0 : i32
    %c0_i32_1 = arith.constant 0 : i32
    return %c0_i32, %c0_i32_0 : i32, i32
  }
  func.func @transform_8(%arg0: i32, %arg1: memref<16xi32, #tpu.memory_space<smem>>, %arg2: memref<16xi32, #tpu.memory_space<smem>>) -> (i32, i32) {
    %c0_i32 = arith.constant 0 : i32
    %c0_i32_0 = arith.constant 0 : i32
    %c0_i32_1 = arith.constant 0 : i32
    return %c0_i32, %c0_i32_0 : i32, i32
  }
  func.func @transform_9(%arg0: i32, %arg1: memref<16xi32, #tpu.memory_space<smem>>, %arg2: memref<16xi32, #tpu.memory_space<smem>>) -> (i32, i32) {
    %c0_i32 = arith.constant 0 : i32
    %c0_i32_0 = arith.constant 0 : i32
    return %arg0, %c0_i32 : i32, i32
  }
}

</mosaic_0001>

<bundles_post_ra>
// kernel: tpu_custom_call.1
= control target key start
LH: loop header
LB: loop body
LE: loop exit
PB: predicated region body
PF: predicated region fallthrough
CT: control target
= control target key end

     0   :  { %s1538_s0 = inlined_call_operand.vmem [shape: s32[16], index: 0, kind: input, shape index: {}]   ;;  %s1539_s2 = inlined_call_operand.vmem [shape: f32[16,32], index: 2, kind: input, shape index: {}]   ;;  %s1540_s3 = inlined_call_operand.vmem [shape: f32[32,32], index: 3, kind: input, shape index: {}]   ;;  %s1541_s4 = inlined_call_operand.vmem [shape: f32[2,32], index: 4, kind: input, shape index: {}]   ;;  %s1542_s5 = inlined_call_operand.vmem [shape: f32[32,32], index: 5, kind: input, shape index: {}]   ;;  %s1543_s6 = inlined_call_operand.vmem [shape: f32[2,32], index: 6, kind: input, shape index: {}]   ;;  %s1544_s7 = inlined_call_operand.vmem [shape: f32[295,32], index: 7, kind: input, shape index: {}]   ;;  %s1545_s8 = inlined_call_operand.vmem [shape: f32[2,32], index: 8, kind: input, shape index: {}]   ;;  %s1546_s9 = inlined_call_operand.vmem [shape: f32[32,32], index: 9, kind: input, shape index: {}]   ;;  %s1547_s10 = inlined_call_operand.vmem [shape: f32[2,32], index: 10, kind: input, shape index: {}]   ;;  %s1548_s11 = inlined_call_operand.hbm [shape: f32[16,512], index: 11, kind: output, shape index: {}]   ;;  %s1549_s1 = inlined_call_operand.vmem [shape: s32[16], index: 1, kind: input, shape index: {}]  }
   0x1   :  { %1551 = sst [smem:[#allocation11_spill]] %s1539_s2  ;;  %s16_s19 = sshll.u32 %s1538_s0, 4  ;;  %s17_s19 = int_to_ptr.vmem [resolvable:$true] %s16_s19 }
   0x2   :  { %s20_s22 = sshll.u32 %s1549_s1, 4  ;;  %s1148_s23 = scalar_lea.vmem %s17_s19, 16  ;;  %s21_s22 = int_to_ptr.vmem [resolvable:$true] %s20_s22 }
   0x3   :  { %p1149_p0 = scmp.ne.s32.totalorder %s17_s19, %s1148_s23  ;;  %p1153_p1 = scmp.lt.s32.totalorder %s17_s19, %s17_s19 }
   0x4   :  { %p1154_p2 = scmp.lt.s32.totalorder %s1148_s23, %s1148_s23 }
   0x6   :  { %p1155_p3 = por %p1154_p2, %p1153_p1 }
   0x8   :  { %p1156_p4 = pnand %p1155_p3, %p1149_p0 }
   0xa   :  { %1159 = shalt.err (!%p1156_p4)  }
   0xb   :  { %s1244_s24 = smov [#allocation5]   ;;  %s1160_s25 = scalar_lea.vmem %s21_s22, 16 }
   0xc   :  { %19 = dma.vmem_to_smem %s17_s19, 16, %s1244_s24, [#allocation4] }
   0xd   :  { %p1161_p5 = scmp.ne.s32.totalorder %s21_s22, %s1160_s25  ;;  %p1165_p6 = scmp.lt.s32.totalorder %s21_s22, %s21_s22 }
   0xe   :  { %p1166_p7 = scmp.lt.s32.totalorder %s1160_s25, %s1160_s25 }
  0x10   :  { %p1167_p8 = por %p1166_p7, %p1165_p6 }
  0x12   :  { %p1168_p9 = pnand %p1167_p8, %p1161_p5 }
  0x14   :  { %1171 = shalt.err (!%p1168_p9)  }
  0x15   :  { %s1245_s0 = smov [#allocation6]  }
  0x16   :  { %23 = dma.vmem_to_smem %s21_s22, 16, %s1245_s0, [#allocation4] }
  0x17   :  { %1218 = dma.done.wait [#allocation4], 32 }
  0x18   :  { %1219 = vsyncadd [#allocation4], 4294967264 }
  0x19   :  { %25 = sfence }
  0x1a   :  { %26 = vsyncpa [#allocation8], 0 }
  0x1b   :  { %28 = vsyncpa [#allocation8 + $0x1], 0  ;;  %s1320_s1 = smov 0   ;;  %s1322_s26 = smov 0  }
  0x1c   :  { %s1324_s27 = smov 0   ;;  %s1326_s28 = smov 0  }
  0x1d LB: > { %s1341_s29 = sadd.s32 4294967295, %s1238_s28   ;;  %s1014_s30 = sadd.s32 4294967294, %s1238_s28   ;;  %s1238_s28 = sphi %s1326_s28, %s1559_s28   ;;  %s1234_s27 = sphi %s1324_s27, %s1558_s27   ;;  %s1230_s26 = sphi %s1322_s26, %s1557_s26   ;;  %s1226_s1 = sphi %s1320_s1, %s1556_s1  }
  0x1e   : > { %s1345_s12 = sadd.s32 1, %s1238_s28   ;;  %s230_s13 = sadd.s32 1, %s1234_s27 }
  0x1f   : > { %s227_s14 = ssub.s32 %s1238_s28, %s1345_s12  ;;  %p240_p10 = scmp.ne.s32.totalorder %s1234_s27, %s1230_s26 }
  0x20   : > { %p228_p11 = scmp.eq.s32.totalorder %s227_s14, 0  ;;  %p241_p12 = scmp.eq.s32.totalorder %s1341_s29, 1 }
  0x21   : > { %p246_p13 = scmp.ne.s32.totalorder %s1230_s26, %s1226_s1  ;;  %p247_p0 = scmp.eq.s32.totalorder %s1014_s30, 1 }
  0x22   : > { %s1356_s15 = scalar_select %p228_p11, %s1234_s27, %s230_s13  }
  0x23   : > { %p1358_p1 = por %p241_p12, %p240_p10  ;;  %p1362_p2 = por %p247_p0, %p246_p13 }
  0x24   : > { %p1016_p3 = scmp.ge.s32.totalorder %s1238_s28, 1  ;;  %p292_p4 = scmp.lt.s32.totalorder %s1238_s28, 3 }
  0x26   : > { %p293_p5 = pnand %p1016_p3, %p292_p4 }
  0x27   : > { %s1550_s18 = sand.u32 (!%p293_p5), 1, %s1230_s26   ;;  %p1018_p6 = scmp.ne.s32.totalorder (!%p293_p5), %s1341_s29, 0 }
  0x28   : > { %296 = sbr.rel (%p293_p5) target bundleno = 1157 (0x485), region = 56  ;;  %s1017_s19 = sshll.u32 (!%p293_p5), %s1550_s18, 5 }
  0x29   : > { %s1371_s20 = scalar_lea.vmem (!%p293_p5), [#allocation7], %s1017_s19 }
  0x2d   : > { %326 = sbr.rel (%p1018_p6) target bundleno = 1013 (0x3f5), region = 60  ;;  %s1554_s2 = sld [smem:[#allocation11_spill]] (!%p1018_p6) }
  0x2e   : > { %s1246_s25 = smov (!%p1018_p6), 32   ;;  %s1247_s0 = smov (!%p1018_p6), 64  }
  0x2f   : > { %s1248_s30 = smov (!%p1018_p6), 96   ;;  %s1240_s13 = smov (!%p1018_p6), 0  }
  0x32   : > { %v332_v0 = vld [vmem:[%s1540_s3 + $0x18] sm:$0xff]  ;;  %v331_v1 = vld [vmem:[%s1540_s3 + $0x10] sm:$0xff]  ;;  %vm333_vm0 = vcmask 261120   ;;  %v330_v3 = vld [vmem:[%s1540_s3 + $0x8] sm:$0xff]  ;;  %v448_v37 = vlaneseq  ;;  %vm647_vm1 = vcmask 523264   ;;  %vm649_vm2 = vcmask 785408  }
  0x33   : > { %1051 = vmatprep.subr.mxu0 %v332_v0  ;;  %v327_v2 = vld [vmem:[%s1554_s2] sm:$0xff]  ;;  %v328_v5 = vld [vmem:[%s1554_s2 + $0x8] sm:$0xff]  ;;  %v465_v6 = vld [vmem:[%s1542_s5 + $0x18] sm:$0xff] }
  0x34   : > { %1052 = vmatpush3.msra.mxu0 %v332_v0  ;;  %1059 = vmatprep.mubr.msk.f32.mxu0 %vm333_vm0, %v327_v2  ;;  %v329_v4 = vld [vmem:[%s1540_s3] sm:$0xff]  ;;  %v464_v7 = vld [vmem:[%s1542_s5 + $0x10] sm:$0xff]  ;;  %v463_v8 = vld [vmem:[%s1542_s5 + $0x8] sm:$0xff]  ;;  %v1411_v38 = vshrl.u32 %v448_v37, 7  ;;  %vm691_vm3 = vcmp.lt.s32.totalorder %v448_v37, 512 }
  0x35   : > { %1053 = vmatprep.subr.mxu0 %v331_v1  ;;  %1062 = vmatprep.subr.mxu1 %v465_v6  ;;  %v462_v9 = vld [vmem:[%s1542_s5] sm:$0xff] }
  0x36   : > { %1054 = vmatpush3.msra.mxu0 %v331_v1  ;;  %1063 = vmatpush3.msra.mxu1 %v465_v6  ;;  %v415_v39 = vld [vmem:[%s1541_s4] sm:$0x3]  ;;  %v1417_v42 = vsub.s32 0, %v1411_v38  ;;  %v1421_v46 = vsub.s32 1, %v1411_v38 }
  0x37   : > { %1055 = vmatprep.subr.mxu0 %v330_v3  ;;  %1064 = vmatprep.subr.mxu1 %v464_v7 }
  0x38   : > { %1056 = vmatpush3.msra.mxu0 %v330_v3  ;;  %1065 = vmatpush3.msra.mxu1 %v464_v7 }
  0x39   : > { %1057 = vmatprep.subr.mxu0 %v329_v4  ;;  %1066 = vmatprep.subr.mxu1 %v463_v8 }
  0x3a   : > { %1058 = vmatpush3.msra.mxu0 %v329_v4  ;;  %1067 = vmatpush3.msra.mxu1 %v463_v8 }
  0x3b   : > { %1060 = vmatmul.mubr.msk.f32.vlgmr.msra.gmra.mxu0 %vm333_vm0, %v328_v5  ;;  %1068 = vmatprep.subr.mxu1 %v462_v9 }
  0x3c   : > { %1069 = vmatpush3.msra.mxu1 %v462_v9 }
  0xfb   : > { %v1061_v10 = vpop.f32.mrf.mxu0 }
  0xfc   : > { %v427_v11 = vmul.f32 %v1061_v10, %v1061_v10  ;;  %v417_v13 = vsel %vm333_vm0, %v1061_v10, 0.0 }
  0xfd   : > { %v406_v12 = vpop.f32.mrf.mxu0 }
  0xfe   : > { %v416_v14 = vsel %vm333_vm0, %v406_v12, 0.0  ;;  %v426_v15 = vmul.f32 %v406_v12, %v406_v12  ;;  %v429_v17 = vsel %vm333_vm0, %v427_v11, 0.0 }
  0xff   : > { %v418_v16 = vadd.f32 %v417_v13, %v416_v14 }
 0x100   : > { %v428_v18 = vsel %vm333_vm0, %v426_v15, 0.0 }
 0x101   : > { %v419_v19 = vrot.slane %v418_v16, 4  ;;  %v430_v20 = vadd.f32 %v429_v17, %v428_v18  ;;  %v547_v18 = vld [vmem:[%s1543_s6] sm:$0x3] }
 0x103   : > { %v420_v21 = vadd.f32 %v419_v19, %v418_v16  ;;  %v431_v22 = vrot.slane %v430_v20, 4 }
 0x105   : > { %v421_v23 = vrot.slane %v420_v21, 2  ;;  %v432_v24 = vadd.f32 %v431_v22, %v430_v20 }
 0x107   : > { %v422_v25 = vadd.f32 %v421_v23, %v420_v21  ;;  %v433_v26 = vrot.slane %v432_v24, 2 }
 0x109   : > { %v423_v27 = vrot.slane %v422_v25, 1  ;;  %v434_v28 = vadd.f32 %v433_v26, %v432_v24 }
 0x10b   : > { %v424_v29 = vadd.f32 %v423_v27, %v422_v25  ;;  %v435_v30 = vrot.slane %v434_v28, 1 }
 0x10d   : > { %v425_v31 = vmul.f32 0.0625, %v424_v29  ;;  %v436_v32 = vadd.f32 %v435_v30, %v434_v28 }
 0x10f   : > { %v437_v33 = vmul.f32 0.0625, %v436_v32  ;;  %v438_v34 = vmul.f32 %v425_v31, %v425_v31 }
 0x111   : > { %v439_v35 = vsub.f32 %v437_v33, %v438_v34 }
 0x113   : > { %v440_v36 = vadd.f32 1e-05, %v439_v35 }
 0x115   : > { %1140 = vrsqrt.f32 %v440_v36 }
 0x122   : > { %v1141_v40 = vpop.eup %1140 }
 0x123   : > { %v442_v41 = vmul.f32 %v1141_v40, %v415_v39 }
 0x125   : > { %v443_v43 = vmul.f32 %v442_v41, %v425_v31  ;;  %v451_v44 = vrot.slane %v442_v41, %v1417_v42 }
 0x127   : > { %v445_v45 = vrot.slane %v443_v43, 7  ;;  %v452_v48 = vmul.f32 %v451_v44, %v406_v12  ;;  %v453_v49 = vmul.f32 %v1061_v10, %v451_v44 }
 0x129   : > { %v447_v47 = vsub.f32 %v415_v39, %v445_v45 }
 0x12b   : > { %v457_v50 = vrot.slane %v447_v47, %v1421_v46 }
 0x12d   : > { %v458_v51 = vadd.f32 %v457_v50, %v452_v48  ;;  %v459_v52 = vadd.f32 %v457_v50, %v453_v49 }
 0x12f   : > { %v460_v53 = vmax.f32 %v458_v51, 0.0  ;;  %v461_v54 = vmax.f32 %v459_v52, 0.0 }
 0x131   : > { %1070 = vmatprep.mubr.msk.f32.mxu1 %vm333_vm0, %v460_v53 }
 0x132   : > { %1071 = vmatmul.mubr.msk.f32.vlgmr.msra.gmra.mxu1 %vm333_vm0, %v461_v54  ;;  %v1249_v54 = vmov 1966171168  }
 0x1f2   : > { %v1072_v55 = vpop.f32.mrf.mxu1 }
 0x1f3   : > { %v559_v56 = vmul.f32 %v1072_v55, %v1072_v55  ;;  %v549_v58 = vsel %vm333_vm0, %v1072_v55, 0.0 }
 0x1f4   : > { %v538_v57 = vpop.f32.mrf.mxu1 }
 0x1f5   : > { %v548_v59 = vsel %vm333_vm0, %v538_v57, 0.0  ;;  %v558_v60 = vmul.f32 %v538_v57, %v538_v57  ;;  %v561_v62 = vsel %vm333_vm0, %v559_v56, 0.0 }
 0x1f6   : > { %v550_v61 = vadd.f32 %v549_v58, %v548_v59 }
 0x1f7   : > { %v560_v63 = vsel %vm333_vm0, %v558_v60, 0.0 }
 0x1f8   : > { %v551_v0 = vrot.slane %v550_v61, 4  ;;  %v562_v1 = vadd.f32 %v561_v62, %v560_v63 }
 0x1fa   : > { %v552_v2 = vadd.f32 %v551_v0, %v550_v61  ;;  %v563_v3 = vrot.slane %v562_v1, 4 }
 0x1fc   : > { %v553_v4 = vrot.slane %v552_v2, 2  ;;  %v564_v5 = vadd.f32 %v563_v3, %v562_v1 }
 0x1fe   : > { %v554_v6 = vadd.f32 %v553_v4, %v552_v2  ;;  %v565_v7 = vrot.slane %v564_v5, 2 }
 0x200   : > { %v555_v8 = vrot.slane %v554_v6, 1  ;;  %v566_v9 = vadd.f32 %v565_v7, %v564_v5 }
 0x202   : > { %v556_v10 = vadd.f32 %v555_v8, %v554_v6  ;;  %v567_v11 = vrot.slane %v566_v9, 1 }
 0x204   : > { %v557_v12 = vmul.f32 0.0625, %v556_v10  ;;  %v568_v13 = vadd.f32 %v567_v11, %v566_v9 }
 0x206   : > { %v569_v14 = vmul.f32 0.0625, %v568_v13  ;;  %v570_v15 = vmul.f32 %v557_v12, %v557_v12 }
 0x208   : > { %v571_v16 = vsub.f32 %v569_v14, %v570_v15 }
 0x20a   : > { %v572_v17 = vadd.f32 1e-05, %v571_v16 }
 0x20c   : > { %1142 = vrsqrt.f32 %v572_v17 }
 0x219   : > { %v1143_v19 = vpop.eup %1142 }
 0x21a   : > { %v574_v20 = vmul.f32 %v1143_v19, %v547_v18 }
 0x21c   : > { %v575_v21 = vmul.f32 %v574_v20, %v557_v12  ;;  %v583_v23 = vrot.slane %v574_v20, %v1417_v42 }
 0x21e   : > { %v577_v22 = vrot.slane %v575_v21, 7  ;;  %v584_v25 = vmul.f32 %v583_v23, %v538_v57  ;;  %v585_v26 = vmul.f32 %v1072_v55, %v583_v23  ;;  %v667_v55 = vunpack.c.l.s4 %v1249_v54 }
 0x220   : > { %v579_v24 = vsub.f32 %v547_v18, %v577_v22  ;;  %v668_v62 = vunpack.c.0.s8 %v667_v55 }
 0x222   : > { %v589_v27 = vrot.slane %v579_v24, %v1421_v46  ;;  %v671_v7 = vsub.s32 %v668_v62, %v1411_v38 }
 0x224   : > { %v590_v28 = vadd.f32 %v589_v27, %v584_v25  ;;  %v591_v29 = vadd.f32 %v589_v27, %v585_v26 }
 0x226   : > { %v620_v30 = vrot.slane %v591_v29, 1  ;;  %v593_v31 = vrot.slane %v590_v28, 1  ;;  %v634_v32 = vrot.slane %v591_v29, 5  ;;  %v607_v33 = vrot.slane %v590_v28, 5 }
 0x227   : > { %v611_v34 = vrot.slane %v590_v28, 6  ;;  %v597_v35 = vrot.slane %v590_v28, 2  ;;  %v638_v36 = vrot.slane %v591_v29, 6  ;;  %v624_v39 = vrot.slane %v591_v29, 2 }
 0x228   : > { %621 = vrot.lane.b32.xlu1 %v620_v30, %s1246_s25  ;;  %594 = vrot.lane.b32.xlu0 %v593_v31, %s1246_s25  ;;  %v615_v40 = vrot.slane %v590_v28, 7  ;;  %v601_v41 = vrot.slane %v590_v28, 3  ;;  %v642_v43 = vrot.slane %v591_v29, 7  ;;  %v628_v44 = vrot.slane %v591_v29, 3 }
 0x229   : > { %v605_v56 = vrot.slane %v590_v28, 4  ;;  %v632_v0 = vrot.slane %v591_v29, 4 }
 0x22c   : > { %635 = vrot.lane.b32.xlu1 %v634_v32, %s1246_s25  ;;  %608 = vrot.lane.b32.xlu0 %v607_v33, %s1246_s25 }
 0x230   : > { %612 = vrot.lane.b32.xlu1 %v611_v34, %s1247_s0  ;;  %598 = vrot.lane.b32.xlu0 %v597_v35, %s1247_s0 }
 0x234   : > { %639 = vrot.lane.b32.xlu1 %v638_v36, %s1247_s0  ;;  %625 = vrot.lane.b32.xlu0 %v624_v39, %s1247_s0 }
 0x238   : > { %616 = vrot.lane.b32.xlu1 %v615_v40, %s1248_s30  ;;  %602 = vrot.lane.b32.xlu0 %v601_v41, %s1248_s30 }
 0x23c   : > { %643 = vrot.lane.b32.xlu1 %v642_v43, %s1248_s30  ;;  %629 = vrot.lane.b32.xlu0 %v628_v44, %s1248_s30 }
 0x29a   : > { %v622_v45 = vpop.permute.xlu1 %621  ;;  %v595_v47 = vpop.permute.xlu0 %594 }
 0x29b   : > { %v646_v57 = vsel %vm333_vm0, %v590_v28, %v595_v47  ;;  %v654_v3 = vsel %vm333_vm0, %v591_v29, %v622_v45 }
 0x29e   : > { %v636_v48 = vpop.permute.xlu1 %635  ;;  %v609_v49 = vpop.permute.xlu0 %608 }
 0x29f   : > { %v651_v58 = vsel %vm333_vm0, %v605_v56, %v609_v49  ;;  %v657_v4 = vsel %vm333_vm0, %v632_v0, %v636_v48 }
 0x2a2   : > { %v613_v50 = vpop.permute.xlu1 %612  ;;  %v599_v51 = vpop.permute.xlu0 %598 }
 0x2a3   : > { %v652_v59 = vsel %vm647_vm1, %v651_v58, %v613_v50  ;;  %v648_v60 = vsel %vm647_vm1, %v646_v57, %v599_v51 }
 0x2a6   : > { %v640_v52 = vpop.permute.xlu1 %639  ;;  %v626_v53 = vpop.permute.xlu0 %625 }
 0x2a7   : > { %v658_v5 = vsel %vm647_vm1, %v657_v4, %v640_v52  ;;  %v655_v6 = vsel %vm647_vm1, %v654_v3, %v626_v53 }
 0x2aa   : > { %v617_v61 = vpop.permute.xlu1 %616  ;;  %v603_v63 = vpop.permute.xlu0 %602 }
 0x2ab   : > { %v653_v1 = vsel %vm649_vm2, %v652_v59, %v617_v61  ;;  %v650_v2 = vsel %vm649_vm2, %v648_v60, %v603_v63 }
 0x2ac   : > { %v664_v8 = vcombine.low %v650_v2, %v653_v1 }
 0x2ae   : > { %v644_v9 = vpop.permute.xlu1 %643  ;;  %v630_v10 = vpop.permute.xlu0 %629  ;;  %v672_v14 = vrot.slane %v664_v8, %v671_v7 }
 0x2af   : > { %v659_v11 = vsel %vm649_vm2, %v658_v5, %v644_v9  ;;  %v656_v12 = vsel %vm649_vm2, %v655_v6, %v630_v10 }
 0x2b0   : > { %v665_v13 = vcombine.low %v656_v12, %v659_v11 }
 0x2b2   : > { %v679_v15 = vrot.slane %v665_v13, %v671_v7 }
 0x2b4   : > { %v680_v16 = vcombine.low %v672_v14, %v679_v15 }
 0x2b6   : > { %v687_v17 = vrot.slane %v680_v16, %v671_v7 }
 0x2b8   : > { %693 = vst.msk [vmem:[#allocation2] sm:$0xf] %vm691_vm3, %v687_v17 }
 0x2b9 LB: >> { %s700_s14 = sld [smem:[#allocation5 + %s1242_s13]]  ;;  %vm709_vm4 = vcmask 253952   ;;  %s708_s30 = scalar_lea.vmem [#allocation3], %s1242_s13  ;;  %s1242_s13 = sphi %s1240_s13, %s699_s13  }
 0x2ba   : >> { %s703_s19 = sld [smem:[#allocation6 + %s1242_s13]]  ;;  %s699_s13 = sadd.s32 1, %s1242_s13  }
 0x2bb   : >> { %p696_p7 = scmp.ge.s32.totalorder %s699_s13, 16  }
 0x2bc   : > { %v763_v19 = vld [vmem:[%s1546_s9 + $0x18] sm:$0xff] (%p696_p7)  ;;  %v762_v20 = vld [vmem:[%s1546_s9 + $0x10] sm:$0xff] (%p696_p7)  ;;  %v761_v23 = vld [vmem:[%s1546_s9 + $0x8] sm:$0xff] (%p696_p7) }
 0x2bd   : > { %1073 = vmatprep.subr.mxu0 (%p696_p7), %v763_v19  ;;  %v760_v29 = vld [vmem:[%s1546_s9] sm:$0xff] (%p696_p7) }
 0x2be   : > { %1074 = vmatpush3.msra.mxu0 (%p696_p7), %v763_v19  ;;  %v713_v54 = vld [vmem:[%s1545_s8] sm:$0x3] (%p696_p7) }
 0x2bf   : >> { %s701_s23 = scalar_lea.vmem %s1544_s7, %s700_s14  ;;  %1075 = vmatprep.subr.mxu0 (%p696_p7), %v762_v20 }
 0x2c0   : >> { %v702_v38 = vld [vmem:[%s701_s23] sm:$0x1]  ;;  %s981_s0 = scalar_lea.vmem %s1544_s7, %s703_s19  ;;  %698 = sbr.rel (!%p696_p7) target bundleno = 697 (0x2b9), region = 103  ;;  %1076 = vmatpush3.msra.mxu0 (%p696_p7), %v762_v20 }
 0x2c1   : >> { %v1023_v18 = vld [vmem:[%s981_s0 + $0x7] sm:$0x1]  ;;  %1077 = vmatprep.subr.mxu0 (%p696_p7), %v761_v23 }
 0x2c2   : >> { %v707_v37 = vadd.f32 %v1023_v18, %v702_v38  ;;  %1078 = vmatpush3.msra.mxu0 (%p696_p7), %v761_v23 }
 0x2c3   : > { %1079 = vmatprep.subr.mxu0 (%p696_p7), %v760_v29 }
 0x2c4   : >> { %710 = vst.msk [vmem:[%s708_s30] sm:$0x1] %vm709_vm4, %v707_v37  ;;  %1080 = vmatpush3.msra.mxu0 (%p696_p7), %v760_v29  ;;  %v845_v29 = vld [vmem:[%s1547_s10] sm:$0x3] (%p696_p7) }
 0x2cb   : > { %v711_v21 = vld [vmem:[#allocation3] sm:$0xff]  ;;  %v712_v22 = vld [vmem:[#allocation3 + $0x8] sm:$0xff] }
 0x2cc   : > { %v714_v24 = vsel %vm333_vm0, %v711_v21, 0.0  ;;  %v715_v25 = vsel %vm333_vm0, %v712_v22, 0.0  ;;  %v724_v26 = vmul.f32 %v711_v21, %v711_v21  ;;  %v725_v27 = vmul.f32 %v712_v22, %v712_v22 }
 0x2cd   : > { %v716_v28 = vadd.f32 %v715_v25, %v714_v24 }
 0x2ce   : > { %v726_v30 = vsel %vm333_vm0, %v724_v26, 0.0  ;;  %v727_v31 = vsel %vm333_vm0, %v725_v27, 0.0 }
 0x2cf   : > { %v717_v32 = vrot.slane %v716_v28, 4  ;;  %v728_v33 = vadd.f32 %v727_v31, %v726_v30 }
 0x2d1   : > { %v718_v34 = vadd.f32 %v717_v32, %v716_v28  ;;  %v729_v35 = vrot.slane %v728_v33, 4 }
 0x2d3   : > { %v719_v36 = vrot.slane %v718_v34, 2  ;;  %v730_v39 = vadd.f32 %v729_v35, %v728_v33 }
 0x2d5   : > { %v720_v40 = vadd.f32 %v719_v36, %v718_v34  ;;  %v731_v41 = vrot.slane %v730_v39, 2 }
 0x2d7   : > { %v721_v43 = vrot.slane %v720_v40, 1  ;;  %v732_v44 = vadd.f32 %v731_v41, %v730_v39 }
 0x2d9   : > { %v722_v45 = vadd.f32 %v721_v43, %v720_v40  ;;  %v733_v47 = vrot.slane %v732_v44, 1 }
 0x2db   : > { %v723_v48 = vmul.f32 0.0625, %v722_v45  ;;  %v734_v49 = vadd.f32 %v733_v47, %v732_v44 }
 0x2dd   : > { %v735_v50 = vmul.f32 0.0625, %v734_v49  ;;  %v736_v51 = vmul.f32 %v723_v48, %v723_v48 }
 0x2df   : > { %v737_v52 = vsub.f32 %v735_v50, %v736_v51 }
 0x2e1   : > { %v738_v53 = vadd.f32 1e-05, %v737_v52 }
 0x2e3   : > { %1144 = vrsqrt.f32 %v738_v53 }
 0x2f0   : > { %v1145_v55 = vpop.eup %1144 }
 0x2f1   : > { %v740_v56 = vmul.f32 %v1145_v55, %v713_v54 }
 0x2f3   : > { %v741_v57 = vmul.f32 %v740_v56, %v723_v48  ;;  %v749_v58 = vrot.slane %v740_v56, %v1417_v42 }
 0x2f5   : > { %v743_v59 = vrot.slane %v741_v57, 7  ;;  %v750_v61 = vmul.f32 %v749_v58, %v711_v21  ;;  %v751_v62 = vmul.f32 %v749_v58, %v712_v22 }
 0x2f7   : > { %v745_v60 = vsub.f32 %v713_v54, %v743_v59 }
 0x2f9   : > { %v755_v63 = vrot.slane %v745_v60, %v1421_v46 }
 0x2fb   : > { %v756_v0 = vadd.f32 %v755_v63, %v750_v61  ;;  %v757_v1 = vadd.f32 %v755_v63, %v751_v62 }
 0x2fd   : > { %v758_v2 = vmax.f32 %v756_v0, 0.0  ;;  %v759_v3 = vmax.f32 %v757_v1, 0.0 }
 0x2ff   : > { %1081 = vmatprep.mubr.msk.f32.mxu0 %vm333_vm0, %v758_v2 }
 0x300   : > { %1082 = vmatmul.mubr.msk.f32.vlgmr.msra.gmra.mxu0 %vm333_vm0, %v759_v3 }
 0x3c0   : > { %v1083_v4 = vpop.f32.mrf.mxu0 }
 0x3c1   : > { %v857_v5 = vmul.f32 %v1083_v4, %v1083_v4  ;;  %v847_v7 = vsel %vm333_vm0, %v1083_v4, 0.0 }
 0x3c2   : > { %v836_v6 = vpop.f32.mrf.mxu0 }
 0x3c3   : > { %v846_v8 = vsel %vm333_vm0, %v836_v6, 0.0  ;;  %v856_v9 = vmul.f32 %v836_v6, %v836_v6  ;;  %v859_v11 = vsel %vm333_vm0, %v857_v5, 0.0 }
 0x3c4   : > { %v848_v10 = vadd.f32 %v847_v7, %v846_v8 }
 0x3c5   : > { %v858_v12 = vsel %vm333_vm0, %v856_v9, 0.0 }
 0x3c6   : > { %v849_v13 = vrot.slane %v848_v10, 4  ;;  %v860_v14 = vadd.f32 %v859_v11, %v858_v12 }
 0x3c8   : > { %v850_v15 = vadd.f32 %v849_v13, %v848_v10  ;;  %v861_v16 = vrot.slane %v860_v14, 4 }
 0x3ca   : > { %v851_v17 = vrot.slane %v850_v15, 2  ;;  %v862_v38 = vadd.f32 %v861_v16, %v860_v14 }
 0x3cc   : > { %v852_v18 = vadd.f32 %v851_v17, %v850_v15  ;;  %v863_v37 = vrot.slane %v862_v38, 2 }
 0x3ce   : > { %v853_v19 = vrot.slane %v852_v18, 1  ;;  %v864_v20 = vadd.f32 %v863_v37, %v862_v38 }
 0x3d0   : > { %v854_v21 = vadd.f32 %v853_v19, %v852_v18  ;;  %v865_v22 = vrot.slane %v864_v20, 1 }
 0x3d2   : > { %v855_v23 = vmul.f32 0.0625, %v854_v21  ;;  %v866_v24 = vadd.f32 %v865_v22, %v864_v20 }
 0x3d4   : > { %v867_v25 = vmul.f32 0.0625, %v866_v24  ;;  %v868_v26 = vmul.f32 %v855_v23, %v855_v23 }
 0x3d6   : > { %v869_v27 = vsub.f32 %v867_v25, %v868_v26 }
 0x3d8   : > { %v870_v28 = vadd.f32 1e-05, %v869_v27 }
 0x3da   : > { %1146 = vrsqrt.f32 %v870_v28 }
 0x3e7   : > { %v1147_v30 = vpop.eup %1146 }
 0x3e8   : > { %v872_v31 = vmul.f32 %v1147_v30, %v845_v29 }
 0x3ea   : > { %v873_v32 = vmul.f32 %v872_v31, %v855_v23  ;;  %v881_v34 = vrot.slane %v872_v31, %v1417_v42 }
 0x3ec   : > { %v875_v33 = vrot.slane %v873_v32, 7  ;;  %v882_v36 = vmul.f32 %v881_v34, %v836_v6  ;;  %v883_v39 = vmul.f32 %v1083_v4, %v881_v34 }
 0x3ee   : > { %v877_v35 = vsub.f32 %v845_v29, %v875_v33 }
 0x3f0   : > { %v887_v40 = vrot.slane %v877_v35, %v1421_v46 }
 0x3f2   : > { %v888_v41 = vadd.f32 %v887_v40, %v882_v36  ;;  %v889_v43 = vadd.f32 %v887_v40, %v883_v39 }
 0x3f4   : > { %890 = vst.msk [vmem:[#allocation3] sm:$0xff] %vm333_vm0, %v888_v41  ;;  %891 = vst.msk [vmem:[#allocation3 + $0x8] sm:$0xff] %vm333_vm0, %v889_v43 }
 0x3f5 PF: > { %s1026_s0 = sshll.u32 %s1341_s29, 3  ;;  %s1250_s21 = smov 32   ;;  %v913_v42 = vlaneseq  ;;  %v911_v51 = vld [vmem:[#allocation2] sm:$0xf]  ;;  %vm905_vm5 = vcmask 261120   ;;  %vm907_vm6 = vcmask 523264  }
 0x3f6   : > { %s893_s30 = scalar_lea.vmem [#allocation3], %s1026_s0  ;;  %s1251_s14 = smov 96   ;;  %vm909_vm7 = vcmask 785408  }
 0x3f7   : > { %s1252_s19 = smov 64   ;;  %v914_v45 = vshrl.u32 %v913_v42, 7  ;;  %s1032_s22 = sshll.u32 %s1341_s29, 9 }
 0x3f8   : > { %s956_s2 = sshll.u32 %s1371_s20, 4  ;;  %s1491_s23 = scalar_lea.hbm %s1548_s11, %s1032_s22  ;;  %s1493_s2 = int_to_ptr.vmem [resolvable:$true] %s956_s2 }
 0x3f9   : > { %v915_v46 = vsub.s32 0, %v914_v45  ;;  %v919_v47 = vsub.s32 1, %v914_v45  ;;  %v923_v48 = vsub.s32 2, %v914_v45  ;;  %v927_v49 = vsub.s32 3, %v914_v45  ;;  %s1555_s29 = sand.u32 1, %s1230_s26   ;;  %s1172_s25 = scalar_lea.vmem %s1493_s2, 512 }
 0x3fa   : > { %s942_s24 = scalar_lea.sflag [#allocation8], %s1555_s29  ;;  %p1173_p8 = scmp.ne.s32.totalorder %s1493_s2, %s1172_s25 }
 0x3fb   : > { %v894_v44 = vld [vmem:[%s893_s30] sm:$0xff]  ;;  %v916_v52 = vrot.slane %v911_v51, %v915_v46  ;;  %v920_v53 = vrot.slane %v911_v51, %v919_v47  ;;  %v924_v54 = vrot.slane %v911_v51, %v923_v48  ;;  %v928_v55 = vrot.slane %v911_v51, %v927_v49  ;;  %s1253_s0 = smov [#allocation7]  }
 0x3fc   : > { %896 = vrot.lane.b32.xlu0 %v894_v44, %s1250_s21  ;;  %902 = vrot.lane.b32.xlu1 %v894_v44, %s1251_s14  ;;  %p1174_p9 = pnand %p1173_p8, %p1358_p1  ;;  %s1176_s30 = sshll.u32 %s1253_s0, 4  ;;  %s1177_s30 = int_to_ptr.vmem [resolvable:$false] %s1176_s30 }
 0x3fd   : > { %s1178_s21 = scalar_lea.vmem %s1177_s30, 1024  ;;  %p1179_p11 = scmp.lt.s32.totalorder %s1493_s2, %s1177_s30 }
 0x3fe   : > { %p1175_p10 = pneg %p1174_p9  ;;  %p1180_p12 = scmp.lt.s32.totalorder %s1178_s21, %s1172_s25 }
 0x400   : > { %899 = vrot.lane.b32.xlu0 %v894_v44, %s1252_s19  ;;  %p1181_p13 = por %p1180_p12, %p1179_p11 }
 0x402   : > { %p1182_p0 = pnand %p1181_p13, %p1175_p10 }
 0x46e   : > { %v897_v50 = vpop.permute.xlu0 %896  ;;  %v903_v56 = vpop.permute.xlu1 %902 }
 0x46f   : > { %v906_v57 = vsel %vm905_vm5, %v894_v44, %v897_v50 }
 0x472   : > { %v900_v58 = vpop.permute.xlu0 %899 }
 0x473   : > { %v908_v59 = vsel %vm907_vm6, %v906_v57, %v900_v58 }
 0x474   : > { %v910_v60 = vsel %vm909_vm7, %v908_v59, %v903_v56 }
 0x475   : > { %v933_v61 = vadd.f32 %v916_v52, %v910_v60  ;;  %v934_v62 = vadd.f32 %v920_v53, %v910_v60  ;;  %v935_v63 = vadd.f32 %v924_v54, %v910_v60  ;;  %v936_v0 = vadd.f32 %v928_v55, %v910_v60 }
 0x477   : > { %937 = vst [vmem:[%s1371_s20] sm:$0xff] %v933_v61  ;;  %938 = vst [vmem:[%s1371_s20 + $0x8] sm:$0xff] %v934_v62 }
 0x478   : > { %939 = vst [vmem:[%s1371_s20 + $0x10] sm:$0xff] %v935_v63  ;;  %940 = vst [vmem:[%s1371_s20 + $0x18] sm:$0xff] %v936_v0 }
 0x479   : > { %1185 = shalt.err (!%p1182_p0)
}
 0x47a   : > { %s1186_s20 = scalar_lea.hbm %s1491_s23, 512  ;;  %s1190_s22 = scalar_lea.hbm %s1548_s11, 1024 }
 0x47b   : > { %p1187_p3 = scmp.ne.s32.totalorder %s1491_s23, %s1186_s20  ;;  %p1191_p6 = scmp.lt.s32.totalorder %s1491_s23, %s1548_s11 }
 0x47c   : > { %p1192_p7 = scmp.lt.s32.totalorder %s1190_s22, %s1186_s20 }
 0x47d   : > { %p1188_p4 = pnand %p1187_p3, %p1358_p1 }
 0x47e   : > { %p1193_p8 = por %p1192_p7, %p1191_p6 }
 0x47f   : > { %p1189_p5 = pneg %p1188_p4 }
 0x481   : > { %p1194_p9 = pnand %p1193_p8, %p1189_p5 }
 0x483   : > { %1197 = shalt.err (!%p1194_p9)
}
 0x484   : > { %1084 = dma.vmem_to_hbm [thread:$0]  (%p1358_p1), %s1493_s2, 512, %s1491_s23, %s942_s24  }
 0x485 PF: > { %p1090_p10 = scmp.ge.s32.totalorder %s1238_s28, 2  ;;  %s968_s29 = sand.u32 1, %s1226_s1  }
 0x486   : > { %s969_s25 = scalar_lea.sflag [#allocation8], %s968_s29 }
 0x487   : > { %p1087_p11 = pnand %p1090_p10, %p1362_p2 }
 0x489   : > { %p1088_p12 = pneg %p1087_p11 }
 0x48b   : > { %1221 = dma.done.wait (%p1088_p12), %s969_s25, 512  }
 0x48c   : > { %1223 = vsyncadd (%p1088_p12), %s969_s25, 4294966784  ;;  %p31_p13 = scmp.ge.s32.totalorder %s1345_s12, 4   ;;  %s1556_s1 = smov %s1230_s26 }
 0x48d   : > { %s1557_s26 = smov %s1234_s27  ;;  %s1558_s27 = smov %s1356_s15 }
 0x48e   : > { %s1559_s28 = smov %s1345_s12  ;;  %33 = sbr.rel (!%p31_p13) target bundleno = 29 (0x1d), region = 114 }
 0x493   :  { %974 = vsyncpa [#allocation8], 1 }
 0x494   :  { %976 = vsyncpa [#allocation8 + $0x1], 1 }

</bundles_post_ra>
